<compile_context>
chip_gen: v7x
topology: tpu7x:2x2x1
jax: 0.10.0
libtpu: 0.0.40
codegen_flags: <defaults>
</compile_context>

<pallas_src>
import functools

import jax
import jax.numpy as jnp
from jax.experimental import pallas as pl
from jax.experimental.pallas import tpu as pltpu

_SELU_ALPHA = 1.6732632423543772
_SELU_SCALE = 1.0507009873554805


def _round_up(x, m):
    return ((x + m - 1) // m) * m


# ---------------------------------------------------------------------------
# Kernel
# ---------------------------------------------------------------------------
def _mlp2_kernel(x_ref, w1_ref, w2_ref, b_ref, out_ref, *,
                 hidden, pad_out2, use_selu):
    mxu_dtype = w1_ref.dtype
    x = x_ref[...]
    if x.dtype != mxu_dtype:
        x = x.astype(mxu_dtype)

    b1 = b_ref[0:1, :hidden]      # [1, hidden]
    b2 = b_ref[1:2, :pad_out2]    # [1, pad_out2]  (padded columns are zero)

    # fc1 (+bias); f32 accumulation on the MXU.
    h = jnp.dot(x, w1_ref[...], preferred_element_type=jnp.float32) + b1

    if use_selu:
        # Clamp the exp argument so the unselected branch never produces inf.
        neg = _SELU_ALPHA * (jnp.exp(jnp.minimum(h, 0.0)) - 1.0)
        h = _SELU_SCALE * jnp.where(h > 0.0, h, neg)
    else:
        h = jnp.maximum(h, 0.0)

    # Dropout: eval-mode identity.

    # Fused fc21 || fc22 (zero-padded to a lane-dense slab) in one matmul,
    # one unmasked lane-dense output store.
    out = jnp.dot(h.astype(mxu_dtype), w2_ref[...],
                  preferred_element_type=jnp.float32) + b2
    out_ref[...] = out.astype(out_ref.dtype)


# ---------------------------------------------------------------------------
# One-time parameter packing (hoisted out of the per-forward path)
# ---------------------------------------------------------------------------
def pack_mlp2_params(w1, b1, w21, b21, w22, b22, *, mxu_dtype=jnp.bfloat16):
    """Pack MLP2 weights once.  Weights are [in, out] (pre-transposed for x@W)."""
    n_in, hidden = w1.shape
    n_out = w21.shape[1]
    out2 = 2 * n_out
    pad_out2 = _round_up(max(out2, 128), 128)      # lane-dense output slab width

    w2 = jnp.concatenate([w21, w22], axis=1)            # [hidden, 2*out]
    w2 = jnp.pad(w2, ((0, 0), (0, pad_out2 - out2)))    # zero pad -> zero out cols

    bwidth = max(hidden, pad_out2)
    bpack = jnp.zeros((2, bwidth), jnp.float32)
    bpack = bpack.at[0, :hidden].set(b1.reshape(-1).astype(jnp.float32))
    bpack = bpack.at[1, :out2].set(
        jnp.concatenate([b21.reshape(-1), b22.reshape(-1)]).astype(jnp.float32))

    return dict(
        w1=w1.astype(mxu_dtype),       # [n_in, hidden]
        w2=w2.astype(mxu_dtype),       # [hidden, pad_out2]
        b=bpack,                       # [2, bwidth]
        n_in=n_in, hidden=hidden, n_out=n_out, out2=out2, pad_out2=pad_out2,
    )


# ---------------------------------------------------------------------------
# Forward
# ---------------------------------------------------------------------------
_SINGLE_BUFFER_WEIGHTS = hasattr(pl, "Buffered")   # resident operands: 1 buffer


def _resident_spec(shape, single_buffer):
    index_map = lambda i: (0,) * len(shape)
    if single_buffer:
        # Constant index_map -> double-buffering is pure VMEM waste.
        return pl.BlockSpec(shape, index_map, pipeline_mode=pl.Buffered(1))
    return pl.BlockSpec(shape, index_map)


def _pick_batch_tile(B, max_batch_tile, target_grid_steps=4):
    # Target >= 2 (ideally ~4) grid steps: required for the auto pipeline to
    # overlap DMA with compute at all, and for "parallel" to shard across
    # v7x's two TensorCores.  Tile rows stay a multiple of 8 (sublane rule).
    if B <= 8:
        return B                                   # block == full dim
    tm = _round_up(pl.cdiv(B, target_grid_steps), 8)
    return max(8, min(tm, max_batch_tile, _round_up(B, 8)))


def mlp2_forward(x, params, *, use_selu=False, max_batch_tile=512, out_dtype=None):
    """MLP2 forward.  `params` comes from pack_mlp2_params (packed once)."""
    global _SINGLE_BUFFER_WEIGHTS

    B, n_in = x.shape
    assert n_in == params["n_in"]
    hidden, n_out = params["hidden"], params["n_out"]
    out2, pad_out2 = params["out2"], params["pad_out2"]
    bwidth = params["b"].shape[1]
    out_dtype = x.dtype if out_dtype is None else out_dtype

    tm = _pick_batch_tile(B, max_batch_tile)
    # Ragged last block (B % tm != 0) is handled by Pallas: padded rows are
    # harmless throw-away work and are never stored back.
    grid = (pl.cdiv(B, tm),)

    kernel = functools.partial(_mlp2_kernel, hidden=hidden, pad_out2=pad_out2,
                               use_selu=use_selu)

    # Explicit VMEM budget: pipelined activation tiles (x2) + resident weights
    # (counted x2 in case single-buffering is unavailable) + f32 intermediates.
    # v5e's scoped default is only 16 MiB; cap at v7x's 64 MiB physical VMEM.
    w_bytes = sum(int(params[k].size) * params[k].dtype.itemsize
                  for k in ("w1", "w2", "b"))
    act_bytes = (tm * n_in * x.dtype.itemsize
                 + tm * pad_out2 * jnp.dtype(out_dtype).itemsize)
    tmp_bytes = tm * (hidden + pad_out2) * 4
    need = 2 * w_bytes + 2 * act_bytes + 2 * tmp_bytes + (2 << 20)
    vmem_limit = int(min(max(need, 16 << 20), 64 << 20))

    def build(single_buffer_weights):
        return pl.pallas_call(
            kernel,
            out_shape=jax.ShapeDtypeStruct((B, pad_out2), out_dtype),
            grid=grid,
            in_specs=[
                pl.BlockSpec((tm, n_in), lambda i: (i, 0)),                 # x (tiled)
                _resident_spec((n_in, hidden), single_buffer_weights),      # W1
                _resident_spec((hidden, pad_out2), single_buffer_weights),  # W21||W22
                _resident_spec((2, bwidth), single_buffer_weights),         # biases
            ],
            out_specs=pl.BlockSpec((tm, pad_out2), lambda i: (i, 0)),       # lane-dense
            compiler_params=pltpu.CompilerParams(
                dimension_semantics=("parallel",),
                vmem_limit_bytes=vmem_limit),
        )

    args = (x, params["w1"], params["w2"], params["b"])
    if _SINGLE_BUFFER_WEIGHTS:
        try:
            out = build(True)(*args)
        except Exception:
            _SINGLE_BUFFER_WEIGHTS = False          # old JAX: no Buffered(1)
            out = build(False)(*args)
    else:
        out = build(False)(*args)

    return out[:, :n_out], out[:, n_out:out2]


# ---------------------------------------------------------------------------
# Pure-JAX reference + test
# ---------------------------------------------------------------------------
def _reference(x, w1, b1, w21, b21, w22, b22, use_selu):
    pre = x.astype(jnp.float32) @ w1 + b1
    if use_selu:
        h = _SELU_SCALE * jnp.where(pre > 0, pre, _SELU_ALPHA * jnp.expm1(pre))
    else:
        h = jnp.maximum(pre, 0.0)
    return h @ w21 + b21, h @ w22 + b22


if __name__ == "__main__":
    # Small shapes consistent with the module: batch=8, input=32, hidden=32, out=16.
    B, n_in, hidden, n_out = 8, 32, 32, 16

    key = jax.random.PRNGKey(0)
    kx, k1, kb1, k21, kb21, k22, kb22, kx2 = jax.random.split(key, 8)

    x = jax.random.normal(kx, (B, n_in), dtype=jnp.float32)
    w1 = jax.random.normal(k1, (n_in, hidden), dtype=jnp.float32) * 0.1
    b1 = jax.random.normal(kb1, (hidden,), dtype=jnp.float32) * 0.1
    w21 = jax.random.normal(k21, (hidden, n_out), dtype=jnp.float32) * 0.1
    b21 = jax.random.normal(kb21, (n_out,), dtype=jnp.float32) * 0.1
    w22 = jax.random.normal(k22, (hidden, n_out), dtype=jnp.float32) * 0.1
    b22 = jax.random.normal(kb22, (n_out,), dtype=jnp.float32) * 0.1

    # Packed ONCE (hoisted out of the forward path).
    params_f32 = pack_mlp2_params(w1, b1, w21, b21, w22, b22, mxu_dtype=jnp.float32)
    params_bf16 = pack_mlp2_params(w1, b1, w21, b21, w22, b22)      # default: bf16 MXU

    # 1) ReLU, f32 operands -> tight tolerance.
    o1, o2 = mlp2_forward(x, params_f32, use_selu=False)
    jax.block_until_ready((o1, o2))
    r1, r2 = _reference(x, w1, b1, w21, b21, w22, b22, use_selu=False)
    assert o1.shape == (B, n_out) and o2.shape == (B, n_out)
    assert jnp.allclose(o1, r1, atol=1e-4, rtol=1e-4), "relu fc21 mismatch"
    assert jnp.allclose(o2, r2, atol=1e-4, rtol=1e-4), "relu fc22 mismatch"

    # 2) SELU, f32 operands.
    s1, s2 = mlp2_forward(x, params_f32, use_selu=True)
    jax.block_until_ready((s1, s2))
    sr1, sr2 = _reference(x, w1, b1, w21, b21, w22, b22, use_selu=True)
    assert jnp.allclose(s1, sr1, atol=1e-4, rtol=1e-4), "selu fc21 mismatch"
    assert jnp.allclose(s2, sr2, atol=1e-4, rtol=1e-4), "selu fc22 mismatch"

    # 3) bf16 activations + bf16 MXU operands (MXU fast path on all chips),
    #    f32 accumulation, bf16 output slab -> loose tolerance.
    xb = x.astype(jnp.bfloat16)
    t1, t2 = mlp2_forward(xb, params_bf16, use_selu=True)
    jax.block_until_ready((t1, t2))
    assert t1.dtype == jnp.bfloat16 and t2.dtype == jnp.bfloat16
    assert jnp.allclose(t1.astype(jnp.float32), sr1, atol=1e-1, rtol=1e-1), "bf16 fc21 mismatch"
    assert jnp.allclose(t2.astype(jnp.float32), sr2, atol=1e-1, rtol=1e-1), "bf16 fc22 mismatch"

    # 4) Multi-step grid with a ragged last batch tile (B=200 -> tm=56, grid=4).
    xw = jax.random.normal(kx2, (200, n_in), dtype=jnp.float32)
    g1, g2 = mlp2_forward(xw, params_f32, use_selu=False)
    jax.block_until_ready((g1, g2))
    gr1, gr2 = _reference(xw, w1, b1, w21, b21, w22, b22, use_selu=False)
    assert jnp.allclose(g1, gr1, atol=1e-4, rtol=1e-4), "tiled fc21 mismatch"
    assert jnp.allclose(g2, gr2, atol=1e-4, rtol=1e-4), "tiled fc22 mismatch"

    print("KERNEL_OK")
</pallas_src>

<mosaic_0001>
module attributes {stable_mosaic.version = 11 : i64} {
  func.func @_mlp2_kernel(%arg0: i32, %arg1: memref<8x32xf32, #tpu.memory_space<vmem>>, %arg2: memref<32x32xf32, #tpu.memory_space<vmem>>, %arg3: memref<32x128xf32, #tpu.memory_space<vmem>>, %arg4: memref<2x128xf32, #tpu.memory_space<vmem>>, %arg5: memref<8x128xf32, #tpu.memory_space<vmem>>) attributes {dimension_semantics = [#tpu.dimension_semantics<parallel>], iteration_bounds = array<i64: 1>, scalar_prefetch = 0 : i64, scratch_operands = 0 : i64, tpu.core_type = #tpu.core_type<tc>, window_params = [{transform_indices = @transform_0, window_bounds = array<i64: 8, 32>}, {pipeline_mode = #tpu.pipeline_mode<synchronous>, transform_indices = @transform_1, window_bounds = array<i64: 32, 32>}, {pipeline_mode = #tpu.pipeline_mode<synchronous>, transform_indices = @transform_2, window_bounds = array<i64: 32, 128>}, {pipeline_mode = #tpu.pipeline_mode<synchronous>, transform_indices = @transform_3, window_bounds = array<i64: 2, 128>}, {transform_indices = @transform_4, window_bounds = array<i64: 8, 128>}]} {
    %c0 = arith.constant 0 : index
    %c0_0 = arith.constant 0 : index
    %0 = vector.load %arg1[%c0, %c0_0] : memref<8x32xf32, #tpu.memory_space<vmem>>, vector<8x32xf32>
    %c0_1 = arith.constant 0 : index
    %c0_2 = arith.constant 0 : index
    %1 = vector.load %arg4[%c0_1, %c0_2] : memref<2x128xf32, #tpu.memory_space<vmem>>, vector<1x32xf32>
    %c1 = arith.constant 1 : index
    %c0_3 = arith.constant 0 : index
    %2 = vector.load %arg4[%c1, %c0_3] : memref<2x128xf32, #tpu.memory_space<vmem>>, vector<1x128xf32>
    %c0_4 = arith.constant 0 : index
    %c0_5 = arith.constant 0 : index
    %3 = vector.load %arg2[%c0_4, %c0_5] : memref<32x32xf32, #tpu.memory_space<vmem>>, vector<32x32xf32>
    %cst = arith.constant dense<0.000000e+00> : vector<8x32xf32>
    %4 = tpu.matmul %0, %3, %cst {dimension_numbers = #tpu.dot_dimension_numbers<[1], [0], [0], [1], [0, 0, 1, 1], [], []>} : vector<8x32xf32>, vector<32x32xf32>, vector<8x32xf32> -> vector<8x32xf32>
    %5 = vector.broadcast %1 : vector<1x32xf32> to vector<8x32xf32>
    %6 = arith.addf %4, %5 : vector<8x32xf32>
    %cst_6 = arith.constant 0.000000e+00 : f32
    %7 = vector.broadcast %cst_6 : f32 to vector<8x32xf32>
    %8 = arith.maximumf %6, %7 : vector<8x32xf32>
    %c0_7 = arith.constant 0 : index
    %c0_8 = arith.constant 0 : index
    %9 = vector.load %arg3[%c0_7, %c0_8] : memref<32x128xf32, #tpu.memory_space<vmem>>, vector<32x128xf32>
    %cst_9 = arith.constant dense<0.000000e+00> : vector<8x128xf32>
    %10 = tpu.matmul %8, %9, %cst_9 {dimension_numbers = #tpu.dot_dimension_numbers<[1], [0], [0], [1], [0, 0, 1, 1], [], []>} : vector<8x32xf32>, vector<32x128xf32>, vector<8x128xf32> -> vector<8x128xf32>
    %11 = vector.broadcast %2 : vector<1x128xf32> to vector<8x128xf32>
    %12 = arith.addf %10, %11 : vector<8x128xf32>
    %c0_10 = arith.constant 0 : index
    %c0_11 = arith.constant 0 : index
    %13 = vector.load %arg5[%c0_10, %c0_11] : memref<8x128xf32, #tpu.memory_space<vmem>>, vector<8x128xf32>
    tpu.vector_store %arg5[%c0_10, %c0_11], %12 {strides = array<i32>} : memref<8x128xf32, #tpu.memory_space<vmem>>, vector<8x128xf32>,
    return
  }
  func.func @transform_0(%arg0: i32) -> (i32, i32) {
    %c0_i32 = arith.constant 0 : i32
    %c0_i32_0 = arith.constant 0 : i32
    return %arg0, %c0_i32 : i32, i32
  }
  func.func @transform_1(%arg0: i32) -> (i32, i32) {
    %c0_i32 = arith.constant 0 : i32
    %c0_i32_0 = arith.constant 0 : i32
    %c0_i32_1 = arith.constant 0 : i32
    return %c0_i32, %c0_i32_0 : i32, i32
  }
  func.func @transform_2(%arg0: i32) -> (i32, i32) {
    %c0_i32 = arith.constant 0 : i32
    %c0_i32_0 = arith.constant 0 : i32
    %c0_i32_1 = arith.constant 0 : i32
    return %c0_i32, %c0_i32_0 : i32, i32
  }
  func.func @transform_3(%arg0: i32) -> (i32, i32) {
    %c0_i32 = arith.constant 0 : i32
    %c0_i32_0 = arith.constant 0 : i32
    %c0_i32_1 = arith.constant 0 : i32
    return %c0_i32, %c0_i32_0 : i32, i32
  }
  func.func @transform_4(%arg0: i32) -> (i32, i32) {
    %c0_i32 = arith.constant 0 : i32
    %c0_i32_0 = arith.constant 0 : i32
    return %arg0, %c0_i32 : i32, i32
  }
}

module attributes {stable_mosaic.version = 11 : i64} {
  func.func @_mlp2_kernel(%arg0: i32, %arg1: memref<8x32xf32, #tpu.memory_space<vmem>>, %arg2: memref<32x32xf32, #tpu.memory_space<vmem>>, %arg3: memref<32x128xf32, #tpu.memory_space<vmem>>, %arg4: memref<2x128xf32, #tpu.memory_space<vmem>>, %arg5: memref<8x128xf32, #tpu.memory_space<vmem>>) attributes {dimension_semantics = [#tpu.dimension_semantics<parallel>], iteration_bounds = array<i64: 1>, scalar_prefetch = 0 : i64, scratch_operands = 0 : i64, tpu.core_type = #tpu.core_type<tc>, window_params = [{transform_indices = @transform_0, window_bounds = array<i64: 8, 32>}, {pipeline_mode = #tpu.pipeline_mode<synchronous>, transform_indices = @transform_1, window_bounds = array<i64: 32, 32>}, {pipeline_mode = #tpu.pipeline_mode<synchronous>, transform_indices = @transform_2, window_bounds = array<i64: 32, 128>}, {pipeline_mode = #tpu.pipeline_mode<synchronous>, transform_indices = @transform_3, window_bounds = array<i64: 2, 128>}, {transform_indices = @transform_4, window_bounds = array<i64: 8, 128>}]} {
    %c0 = arith.constant 0 : index
    %c0_0 = arith.constant 0 : index
    %0 = vector.load %arg1[%c0, %c0_0] : memref<8x32xf32, #tpu.memory_space<vmem>>, vector<8x32xf32>
    %c0_1 = arith.constant 0 : index
    %c0_2 = arith.constant 0 : index
    %1 = vector.load %arg4[%c0_1, %c0_2] : memref<2x128xf32, #tpu.memory_space<vmem>>, vector<1x32xf32>
    %c1 = arith.constant 1 : index
    %c0_3 = arith.constant 0 : index
    %2 = vector.load %arg4[%c1, %c0_3] : memref<2x128xf32, #tpu.memory_space<vmem>>, vector<1x128xf32>
    %c0_4 = arith.constant 0 : index
    %c0_5 = arith.constant 0 : index
    %3 = vector.load %arg2[%c0_4, %c0_5] : memref<32x32xf32, #tpu.memory_space<vmem>>, vector<32x32xf32>
    %cst = arith.constant dense<0.000000e+00> : vector<8x32xf32>
    %4 = tpu.matmul %0, %3, %cst {dimension_numbers = #tpu.dot_dimension_numbers<[1], [0], [0], [1], [0, 0, 1, 1], [], []>} : vector<8x32xf32>, vector<32x32xf32>, vector<8x32xf32> -> vector<8x32xf32>
    %5 = vector.broadcast %1 : vector<1x32xf32> to vector<8x32xf32>
    %6 = arith.addf %4, %5 : vector<8x32xf32>
    %cst_6 = arith.constant 0.000000e+00 : f32
    %7 = vector.broadcast %cst_6 : f32 to vector<8x32xf32>
    %8 = arith.maximumf %6, %7 : vector<8x32xf32>
    %c0_7 = arith.constant 0 : index
    %c0_8 = arith.constant 0 : index
    %9 = vector.load %arg3[%c0_7, %c0_8] : memref<32x128xf32, #tpu.memory_space<vmem>>, vector<32x128xf32>
    %cst_9 = arith.constant dense<0.000000e+00> : vector<8x128xf32>
    %10 = tpu.matmul %8, %9, %cst_9 {dimension_numbers = #tpu.dot_dimension_numbers<[1], [0], [0], [1], [0, 0, 1, 1], [], []>} : vector<8x32xf32>, vector<32x128xf32>, vector<8x128xf32> -> vector<8x128xf32>
    %11 = vector.broadcast %2 : vector<1x128xf32> to vector<8x128xf32>
    %12 = arith.addf %10, %11 : vector<8x128xf32>
    %c0_10 = arith.constant 0 : index
    %c0_11 = arith.constant 0 : index
    %13 = vector.load %arg5[%c0_10, %c0_11] : memref<8x128xf32, #tpu.memory_space<vmem>>, vector<8x128xf32>
    tpu.vector_store %arg5[%c0_10, %c0_11], %12 {strides = array<i32>} : memref<8x128xf32, #tpu.memory_space<vmem>>, vector<8x128xf32>,
    return
  }
  func.func @transform_0(%arg0: i32) -> (i32, i32) {
    %c0_i32 = arith.constant 0 : i32
    %c0_i32_0 = arith.constant 0 : i32
    return %arg0, %c0_i32 : i32, i32
  }
  func.func @transform_1(%arg0: i32) -> (i32, i32) {
    %c0_i32 = arith.constant 0 : i32
    %c0_i32_0 = arith.constant 0 : i32
    %c0_i32_1 = arith.constant 0 : i32
    return %c0_i32, %c0_i32_0 : i32, i32
  }
  func.func @transform_2(%arg0: i32) -> (i32, i32) {
    %c0_i32 = arith.constant 0 : i32
    %c0_i32_0 = arith.constant 0 : i32
    %c0_i32_1 = arith.constant 0 : i32
    return %c0_i32, %c0_i32_0 : i32, i32
  }
  func.func @transform_3(%arg0: i32) -> (i32, i32) {
    %c0_i32 = arith.constant 0 : i32
    %c0_i32_0 = arith.constant 0 : i32
    %c0_i32_1 = arith.constant 0 : i32
    return %c0_i32, %c0_i32_0 : i32, i32
  }
  func.func @transform_4(%arg0: i32) -> (i32, i32) {
    %c0_i32 = arith.constant 0 : i32
    %c0_i32_0 = arith.constant 0 : i32
    return %arg0, %c0_i32 : i32, i32
  }
}

</mosaic_0001>

<bundles_post_ra>
// kernel: tpu_custom_call.1
= control target key start
LH: loop header
LB: loop body
LE: loop exit
PB: predicated region body
PF: predicated region fallthrough
CT: control target
= control target key end

     0   :  { %9 = vsyncpa [#allocation3], 0  ;;  %s486_s0 = inlined_call_operand.hbm [shape: f32[8,32], index: 0, kind: input, shape index: {}]   ;;  %s487_s1 = inlined_call_operand.hbm [shape: f32[32,32], index: 1, kind: input, shape index: {}]   ;;  %s488_s2 = inlined_call_operand.hbm [shape: f32[32,128], index: 2, kind: input, shape index: {}]   ;;  %s489_s3 = inlined_call_operand.vmem [shape: f32[2,128], index: 3, kind: input, shape index: {}]   ;;  %s490_s4 = inlined_call_operand.hbm [shape: f32[8,128], index: 4, kind: output, shape index: {}]  }
   0x1   :  { %10 = vsyncpa [#allocation6], 0 }
   0x2   :  { %11 = vsyncpa [#allocation4], 0  ;;  %s392_s15 = smov [#allocation5]   ;;  %s298_s19 = scalar_lea.hbm %s487_s1, 512 }
   0x3   :  { %s27_s16 = sshll.u32 %s392_s15, 4  ;;  %p299_p0 = scmp.ne.s32.totalorder %s487_s1, %s298_s19  ;;  %s28_s16 = int_to_ptr.vmem [resolvable:$true] %s27_s16 }
   0x4   :  { %p302_p1 = scmp.lt.u32.totalorder %s298_s19, %s487_s1 }
   0x6   :  { %p304_p2 = pnand %p302_p1, %p299_p0 }
   0x8   :  { %307 = shalt.err (!%p304_p2)
}
   0x9   :  { %s308_s24 = scalar_lea.vmem %s28_s16, 512  ;;  %p313_p4 = scmp.lt.s32.totalorder %s28_s16, %s28_s16 }
   0xa   :  { %p309_p3 = scmp.ne.s32.totalorder %s28_s16, %s308_s24  ;;  %p314_p5 = scmp.lt.s32.totalorder %s308_s24, %s308_s24 }
   0xc   :  { %p315_p6 = por %p314_p5, %p313_p4 }
   0xe   :  { %p316_p7 = pnand %p315_p6, %p309_p3 }
  0x10   :  { %319 = shalt.err (!%p316_p7)
}
  0x11   :  { %s393_s25 = smov 128   ;;  %s394_s26 = smov 8  }
  0x12   :  { %33 = dma.hbm_to_vmem [thread:$0]  %s487_s1, 512, %s28_s16, [#allocation6], %s393_s25, %s393_s25, %s394_s26  }
  0x13   :  { %s395_s29 = smov [#allocation2]   ;;  %s396_s5 = smov [#allocation7]  }
  0x14   :  { %s18_s30 = sshll.u32 %s395_s29, 4  ;;  %s39_s6 = sshll.u32 %s396_s5, 4  ;;  %s19_s30 = int_to_ptr.vmem [resolvable:$true] %s18_s30  ;;  %s40_s6 = int_to_ptr.vmem [resolvable:$true] %s39_s6 }
  0x15   :  { %s320_s9 = scalar_lea.hbm %s486_s0, 128 }
  0x16   :  { %p321_p8 = scmp.ne.s32.totalorder %s486_s0, %s320_s9  ;;  %p324_p9 = scmp.lt.u32.totalorder %s320_s9, %s486_s0 }
  0x18   :  { %p326_p10 = pnand %p324_p9, %p321_p8 }
  0x1a   :  { %329 = shalt.err (!%p326_p10)
}
  0x1b   :  { %s330_s1 = scalar_lea.vmem %s19_s30, 128  ;;  %p335_p12 = scmp.lt.s32.totalorder %s19_s30, %s19_s30 }
  0x1c   :  { %p331_p11 = scmp.ne.s32.totalorder %s19_s30, %s330_s1  ;;  %p336_p13 = scmp.lt.s32.totalorder %s330_s1, %s330_s1 }
  0x1e   :  { %p337_p0 = por %p336_p13, %p335_p12 }
  0x20   :  { %p338_p1 = pnand %p337_p0, %p331_p11 }
  0x22   :  { %341 = shalt.err (!%p338_p1)
}
  0x23   :  { %21 = dma.hbm_to_vmem [thread:$0]  %s486_s0, 128, %s19_s30, [#allocation3]  }
  0x24   :  { %s342_s18 = scalar_lea.hbm %s488_s2, 512 }
  0x25   :  { %p343_p2 = scmp.ne.s32.totalorder %s488_s2, %s342_s18  ;;  %p346_p3 = scmp.lt.u32.totalorder %s342_s18, %s488_s2 }
  0x27   :  { %p348_p4 = pnand %p346_p3, %p343_p2 }
  0x29   :  { %351 = shalt.err (!%p348_p4)
}
  0x2a   :  { %s352_s23 = scalar_lea.vmem %s40_s6, 512  ;;  %p357_p6 = scmp.lt.s32.totalorder %s40_s6, %s40_s6 }
  0x2b   :  { %p353_p5 = scmp.ne.s32.totalorder %s40_s6, %s352_s23  ;;  %p358_p7 = scmp.lt.s32.totalorder %s352_s23, %s352_s23 }
  0x2d   :  { %p359_p8 = por %p358_p7, %p357_p6 }
  0x2f   :  { %p360_p9 = pnand %p359_p8, %p353_p5 }
  0x31   :  { %363 = shalt.err (!%p360_p9)
}
  0x32   :  { %45 = dma.hbm_to_vmem [thread:$0]  %s488_s2, 512, %s40_s6, [#allocation6], %s393_s25, %s393_s25, %s394_s26  }
  0x33   :  { %386 = dma.done.wait [#allocation3], 128  }
  0x34   :  { %387 = vsyncadd [#allocation3], 4294967168 }
  0x35   :  { %388 = dma.done.wait [#allocation6], 1024  }
  0x36   :  { %389 = vsyncadd [#allocation6], 4294966272  ;;  %v397_v0 = vmov 0.0|0.0   ;;  %vm398_vm0 = vmmov 0   ;;  %v399_v1 = vmov 0.0   ;;  %v60_v2 = vld [vmem:[#allocation5] sm:$0xff] }
  0x37   :  { %277 = vmatprep.subr.bf16.mxu0 %v397_v0  ;;  %263 = vmatprep.mubr.msk.f32.mxu0 %vm398_vm0, %v399_v1  ;;  %v61_v3 = vld [vmem:[#allocation5 + $0x8] sm:$0xff]  ;;  %v62_v4 = vld [vmem:[#allocation5 + $0x10] sm:$0xff]  ;;  %v63_v6 = vld [vmem:[#allocation5 + $0x18] sm:$0xff]  ;;  %vm68_vm1 = vcmask 261120   ;;  %s400_s28 = smov [#allocation8]  }
  0x38   :  { %283 = vmatprep.subr.bf16.mxu1 %v397_v0  ;;  %274 = vmatprep.mubr.msk.f32.mxu1 %vm398_vm0, %v399_v1  ;;  %v278_v5 = vpack.c.bf16 %v61_v3, %v60_v2  ;;  %v143_v7 = vld [vmem:[#allocation7] sm:$0xff]  ;;  %v144_v8 = vld [vmem:[#allocation7 + $0x8] sm:$0xff]  ;;  %v281_v9 = vpack.c.bf16 %v63_v6, %v62_v4  ;;  %v57_v11 = vld [vmem:[#allocation2] sm:$0xff]  ;;  %s231_s29 = sshll.u32 %s400_s28, 4  ;;  %s232_s29 = int_to_ptr.vmem [resolvable:$true] %s231_s29 }
  0x39   :  { %v284_v10 = vpack.c.bf16 %v144_v8, %v143_v7  ;;  %v145_v12 = vld [vmem:[#allocation7 + $0x10] sm:$0xff]  ;;  %v146_v13 = vld [vmem:[#allocation7 + $0x18] sm:$0xff]  ;;  %s364_s30 = scalar_lea.vmem %s232_s29, 128  ;;  %p369_p11 = scmp.lt.s32.totalorder %s232_s29, %s232_s29 }
  0x3a   :  { %279 = vmatpush3.bf16.msra.mxu0 %v278_v5  ;;  %v287_v14 = vpack.c.bf16 %v146_v13, %v145_v12  ;;  %v241_v15 = vld [vmem:[%s489_s3] ss:$0 sm:$0xff]  ;;  %v243_v20 = vld [vmem:[%s489_s3 + $0x1] ss:$0 sm:$0xff]  ;;  %p365_p10 = scmp.ne.s32.totalorder %s232_s29, %s364_s30  ;;  %p370_p12 = scmp.lt.s32.totalorder %s364_s30, %s364_s30 }
  0x3b   :  { %280 = vmatprep.subr.bf16.mxu0 %v397_v0  ;;  %285 = vmatpush3.bf16.msra.mxu1 %v284_v10 }
  0x3c   :  { %286 = vmatprep.subr.bf16.mxu1 %v397_v0  ;;  %p371_p13 = por %p370_p12, %p369_p11 }
  0x3e   :  { %282 = vmatpush3.bf16.msra.mxu0 %v281_v9  ;;  %p372_p0 = pnand %p371_p13, %p365_p10 }
  0x3f   :  { %288 = vmatpush3.bf16.msra.mxu1 %v287_v14 }
  0x41   :  { %264 = vmatmul.mubr.msk.f32.vlgmr.msra.gmra.mrb[0].mxu0 %vm68_vm1, %v57_v11 }
 0x114   :  { %v138_v16 = vpop.f32.mrb[0].mxu0 }
 0x115   :  { %v139_v17 = vadd.f32 %v241_v15, %v138_v16  ;;  %v265_v18 = vpop.f32.mrb[1].mxu0 }
 0x117   :  { %v142_v19 = vmax.f32 %v139_v17, 0.0 }
 0x119   :  { %275 = vmatmul.mubr.msk.f32.vlgmr.msra.gmra.mrb[0].mxu1 %vm68_vm1, %v142_v19 }
 0x1ec   :  { %v220_v21 = vpop.f32.mrb[0].mxu1 }
 0x1ed   :  { %v221_v22 = vadd.f32 %v243_v20, %v220_v21  ;;  %v276_v23 = vpop.f32.mrb[1].mxu1 }
 0x1ef   :  { %224 = vst [vmem:[#allocation8] sm:$0xff] %v221_v22 }
 0x1f0   :  { %375 = shalt.err (!%p372_p0)
}
 0x1f1   :  { %s376_s7 = scalar_lea.hbm %s490_s4, 128 }
 0x1f2   :  { %p377_p1 = scmp.ne.s32.totalorder %s490_s4, %s376_s7  ;;  %p380_p2 = scmp.lt.u32.totalorder %s376_s7, %s490_s4 }
 0x1f4   :  { %p382_p3 = pnand %p380_p2, %p377_p1 }
 0x1f6   :  { %385 = shalt.err (!%p382_p3)
}
 0x1f7   :  { %234 = dma.vmem_to_hbm [thread:$0]  %s232_s29, 128, %s490_s4, [#allocation4]  }
 0x1f8   :  { %390 = dma.done.wait [#allocation4], 128  }
 0x1f9   :  { %391 = vsyncadd [#allocation4], 4294967168 }
 0x1fa   :  { %238 = vsyncpa [#allocation3], 1 }
 0x1fb   :  { %239 = vsyncpa [#allocation6], 1 }
 0x1fc   :  { %240 = vsyncpa [#allocation4], 1 }

// kernel: tpu_custom_call.1
= control target key start
LH: loop header
LB: loop body
LE: loop exit
PB: predicated region body
PF: predicated region fallthrough
CT: control target
= control target key end

     0   :  { %9 = vsyncpa [#allocation3], 0  ;;  %s486_s0 = inlined_call_operand.hbm [shape: f32[8,32], index: 0, kind: input, shape index: {}]   ;;  %s487_s1 = inlined_call_operand.hbm [shape: f32[32,32], index: 1, kind: input, shape index: {}]   ;;  %s488_s2 = inlined_call_operand.hbm [shape: f32[32,128], index: 2, kind: input, shape index: {}]   ;;  %s489_s3 = inlined_call_operand.vmem [shape: f32[2,128], index: 3, kind: input, shape index: {}]   ;;  %s490_s4 = inlined_call_operand.hbm [shape: f32[8,128], index: 4, kind: output, shape index: {}]  }
   0x1   :  { %10 = vsyncpa [#allocation6], 0 }
   0x2   :  { %11 = vsyncpa [#allocation4], 0  ;;  %s392_s15 = smov [#allocation5]   ;;  %s298_s19 = scalar_lea.hbm %s487_s1, 512 }
   0x3   :  { %s27_s16 = sshll.u32 %s392_s15, 4  ;;  %p299_p0 = scmp.ne.s32.totalorder %s487_s1, %s298_s19  ;;  %s28_s16 = int_to_ptr.vmem [resolvable:$true] %s27_s16 }
   0x4   :  { %p302_p1 = scmp.lt.u32.totalorder %s298_s19, %s487_s1 }
   0x6   :  { %p304_p2 = pnand %p302_p1, %p299_p0 }
   0x8   :  { %307 = shalt.err (!%p304_p2)
}
   0x9   :  { %s308_s24 = scalar_lea.vmem %s28_s16, 512  ;;  %p313_p4 = scmp.lt.s32.totalorder %s28_s16, %s28_s16 }
   0xa   :  { %p309_p3 = scmp.ne.s32.totalorder %s28_s16, %s308_s24  ;;  %p314_p5 = scmp.lt.s32.totalorder %s308_s24, %s308_s24 }
   0xc   :  { %p315_p6 = por %p314_p5, %p313_p4 }
   0xe   :  { %p316_p7 = pnand %p315_p6, %p309_p3 }
  0x10   :  { %319 = shalt.err (!%p316_p7)
}
  0x11   :  { %s393_s25 = smov 128   ;;  %s394_s26 = smov 8  }
  0x12   :  { %33 = dma.hbm_to_vmem [thread:$0]  %s487_s1, 512, %s28_s16, [#allocation6], %s393_s25, %s393_s25, %s394_s26  }
  0x13   :  { %s395_s29 = smov [#allocation2]   ;;  %s396_s5 = smov [#allocation7]  }
  0x14   :  { %s18_s30 = sshll.u32 %s395_s29, 4  ;;  %s39_s6 = sshll.u32 %s396_s5, 4  ;;  %s19_s30 = int_to_ptr.vmem [resolvable:$true] %s18_s30  ;;  %s40_s6 = int_to_ptr.vmem [resolvable:$true] %s39_s6 }
  0x15   :  { %s320_s9 = scalar_lea.hbm %s486_s0, 128 }
  0x16   :  { %p321_p8 = scmp.ne.s32.totalorder %s486_s0, %s320_s9  ;;  %p324_p9 = scmp.lt.u32.totalorder %s320_s9, %s486_s0 }
  0x18   :  { %p326_p10 = pnand %p324_p9, %p321_p8 }
  0x1a   :  { %329 = shalt.err (!%p326_p10)
}
  0x1b   :  { %s330_s1 = scalar_lea.vmem %s19_s30, 128  ;;  %p335_p12 = scmp.lt.s32.totalorder %s19_s30, %s19_s30 }
  0x1c   :  { %p331_p11 = scmp.ne.s32.totalorder %s19_s30, %s330_s1  ;;  %p336_p13 = scmp.lt.s32.totalorder %s330_s1, %s330_s1 }
  0x1e   :  { %p337_p0 = por %p336_p13, %p335_p12 }
  0x20   :  { %p338_p1 = pnand %p337_p0, %p331_p11 }
  0x22   :  { %341 = shalt.err (!%p338_p1)
}
  0x23   :  { %21 = dma.hbm_to_vmem [thread:$0]  %s486_s0, 128, %s19_s30, [#allocation3]  }
  0x24   :  { %s342_s18 = scalar_lea.hbm %s488_s2, 512 }
  0x25   :  { %p343_p2 = scmp.ne.s32.totalorder %s488_s2, %s342_s18  ;;  %p346_p3 = scmp.lt.u32.totalorder %s342_s18, %s488_s2 }
  0x27   :  { %p348_p4 = pnand %p346_p3, %p343_p2 }
  0x29   :  { %351 = shalt.err (!%p348_p4)
}
  0x2a   :  { %s352_s23 = scalar_lea.vmem %s40_s6, 512  ;;  %p357_p6 = scmp.lt.s32.totalorder %s40_s6, %s40_s6 }
  0x2b   :  { %p353_p5 = scmp.ne.s32.totalorder %s40_s6, %s352_s23  ;;  %p358_p7 = scmp.lt.s32.totalorder %s352_s23, %s352_s23 }
  0x2d   :  { %p359_p8 = por %p358_p7, %p357_p6 }
  0x2f   :  { %p360_p9 = pnand %p359_p8, %p353_p5 }
  0x31   :  { %363 = shalt.err (!%p360_p9)
}
  0x32   :  { %45 = dma.hbm_to_vmem [thread:$0]  %s488_s2, 512, %s40_s6, [#allocation6], %s393_s25, %s393_s25, %s394_s26  }
  0x33   :  { %386 = dma.done.wait [#allocation3], 128  }
  0x34   :  { %387 = vsyncadd [#allocation3], 4294967168 }
  0x35   :  { %388 = dma.done.wait [#allocation6], 1024  }
  0x36   :  { %389 = vsyncadd [#allocation6], 4294966272  ;;  %v397_v0 = vmov 0.0|0.0   ;;  %vm398_vm0 = vmmov 0   ;;  %v399_v1 = vmov 0.0   ;;  %v60_v2 = vld [vmem:[#allocation5] sm:$0xff] }
  0x37   :  { %277 = vmatprep.subr.bf16.mxu0 %v397_v0  ;;  %263 = vmatprep.mubr.msk.f32.mxu0 %vm398_vm0, %v399_v1  ;;  %v61_v3 = vld [vmem:[#allocation5 + $0x8] sm:$0xff]  ;;  %v62_v4 = vld [vmem:[#allocation5 + $0x10] sm:$0xff]  ;;  %v63_v6 = vld [vmem:[#allocation5 + $0x18] sm:$0xff]  ;;  %vm68_vm1 = vcmask 261120   ;;  %s400_s28 = smov [#allocation8]  }
  0x38   :  { %283 = vmatprep.subr.bf16.mxu1 %v397_v0  ;;  %274 = vmatprep.mubr.msk.f32.mxu1 %vm398_vm0, %v399_v1  ;;  %v278_v5 = vpack.c.bf16 %v61_v3, %v60_v2  ;;  %v143_v7 = vld [vmem:[#allocation7] sm:$0xff]  ;;  %v144_v8 = vld [vmem:[#allocation7 + $0x8] sm:$0xff]  ;;  %v281_v9 = vpack.c.bf16 %v63_v6, %v62_v4  ;;  %v57_v11 = vld [vmem:[#allocation2] sm:$0xff]  ;;  %s231_s29 = sshll.u32 %s400_s28, 4  ;;  %s232_s29 = int_to_ptr.vmem [resolvable:$true] %s231_s29 }
  0x39   :  { %v284_v10 = vpack.c.bf16 %v144_v8, %v143_v7  ;;  %v145_v12 = vld [vmem:[#allocation7 + $0x10] sm:$0xff]  ;;  %v146_v13 = vld [vmem:[#allocation7 + $0x18] sm:$0xff]  ;;  %s364_s30 = scalar_lea.vmem %s232_s29, 128  ;;  %p369_p11 = scmp.lt.s32.totalorder %s232_s29, %s232_s29 }
  0x3a   :  { %279 = vmatpush3.bf16.msra.mxu0 %v278_v5  ;;  %v287_v14 = vpack.c.bf16 %v146_v13, %v145_v12  ;;  %v241_v15 = vld [vmem:[%s489_s3] ss:$0 sm:$0xff]  ;;  %v243_v20 = vld [vmem:[%s489_s3 + $0x1] ss:$0 sm:$0xff]  ;;  %p365_p10 = scmp.ne.s32.totalorder %s232_s29, %s364_s30  ;;  %p370_p12 = scmp.lt.s32.totalorder %s364_s30, %s364_s30 }
  0x3b   :  { %280 = vmatprep.subr.bf16.mxu0 %v397_v0  ;;  %285 = vmatpush3.bf16.msra.mxu1 %v284_v10 }
  0x3c   :  { %286 = vmatprep.subr.bf16.mxu1 %v397_v0  ;;  %p371_p13 = por %p370_p12, %p369_p11 }
  0x3e   :  { %282 = vmatpush3.bf16.msra.mxu0 %v281_v9  ;;  %p372_p0 = pnand %p371_p13, %p365_p10 }
  0x3f   :  { %288 = vmatpush3.bf16.msra.mxu1 %v287_v14 }
  0x41   :  { %264 = vmatmul.mubr.msk.f32.vlgmr.msra.gmra.mrb[0].mxu0 %vm68_vm1, %v57_v11 }
 0x114   :  { %v138_v16 = vpop.f32.mrb[0].mxu0 }
 0x115   :  { %v139_v17 = vadd.f32 %v241_v15, %v138_v16  ;;  %v265_v18 = vpop.f32.mrb[1].mxu0 }
 0x117   :  { %v142_v19 = vmax.f32 %v139_v17, 0.0 }
 0x119   :  { %275 = vmatmul.mubr.msk.f32.vlgmr.msra.gmra.mrb[0].mxu1 %vm68_vm1, %v142_v19 }
 0x1ec   :  { %v220_v21 = vpop.f32.mrb[0].mxu1 }
 0x1ed   :  { %v221_v22 = vadd.f32 %v243_v20, %v220_v21  ;;  %v276_v23 = vpop.f32.mrb[1].mxu1 }
 0x1ef   :  { %224 = vst [vmem:[#allocation8] sm:$0xff] %v221_v22 }
 0x1f0   :  { %375 = shalt.err (!%p372_p0)
}
 0x1f1   :  { %s376_s7 = scalar_lea.hbm %s490_s4, 128 }
 0x1f2   :  { %p377_p1 = scmp.ne.s32.totalorder %s490_s4, %s376_s7  ;;  %p380_p2 = scmp.lt.u32.totalorder %s376_s7, %s490_s4 }
 0x1f4   :  { %p382_p3 = pnand %p380_p2, %p377_p1 }
 0x1f6   :  { %385 = shalt.err (!%p382_p3)
}
 0x1f7   :  { %234 = dma.vmem_to_hbm [thread:$0]  %s232_s29, 128, %s490_s4, [#allocation4]  }
 0x1f8   :  { %390 = dma.done.wait [#allocation4], 128  }
 0x1f9   :  { %391 = vsyncadd [#allocation4], 4294967168 }
 0x1fa   :  { %238 = vsyncpa [#allocation3], 1 }
 0x1fb   :  { %239 = vsyncpa [#allocation6], 1 }
 0x1fc   :  { %240 = vsyncpa [#allocation4], 1 }

</bundles_post_ra>
